<compile_context>
chip_gen: v7x
topology: tpu7x:2x2x1
jax: 0.10.0
libtpu: 0.0.40
codegen_flags: <defaults>
</compile_context>

<pallas_src>
import jax
import jax.numpy as jnp
from jax.experimental import pallas as pl
from jax.experimental.pallas import tpu as pltpu


# ----------------------------------------------------------------------------
# Fused EvolutionCell kernel (single invocation, everything in VMEM).
# ----------------------------------------------------------------------------
def _make_evolution_kernel(B: int, L: int, max_step: int):
    def kernel(*refs):
        # refs: x, support_0..support_{L-1}, Wcat_0..Wcat_{L-1}, bias, w_att, out
        x_ref = refs[0]                       # [B, N, Din]
        s_refs = refs[1:1 + L]                # each [N, N]
        w_refs = refs[1 + L:1 + 2 * L]        # layer l: [M*F_in_l, Dout]
        b_ref = refs[1 + 2 * L]               # [L, 1, Dout]
        watt_ref = refs[2 + 2 * L]            # [N, Dout]
        o_ref = refs[3 + 2 * L]               # [B, N, Dout]

        watt = watt_ref[...].astype(jnp.float32)          # [N, Dout]

        for b in range(B):                                 # static unroll (small B)
            h = x_ref[b].astype(jnp.float32)               # [N, F_in]
            layer_out = []
            for l in range(L):                             # static unroll over layers
                s = s_refs[l][...].astype(jnp.float32)     # [N, N]

                # Chebyshev-style diffusion metrics: x0, S@x0, 2*S@x1 - x0, ...
                metrics = [h]
                if max_step > 0:
                    x1 = jnp.dot(s, h, preferred_element_type=jnp.float32)
                    metrics.append(x1)
                    xk2, xk1 = h, x1
                    for _ in range(2, max_step + 1):
                        xk = (2.0 * jnp.dot(s, xk1,
                                            preferred_element_type=jnp.float32)
                              - xk2)
                        metrics.append(xk)
                        xk2, xk1 = xk1, xk

                # One lane-dense matmul per (layer, batch): [N, M*F_in]x[M*F_in, Dout]
                if len(metrics) == 1:
                    X = metrics[0]
                else:
                    X = jnp.concatenate(metrics, axis=-1)
                h = (jnp.dot(X, w_refs[l][...],
                             preferred_element_type=jnp.float32)
                     + b_ref[l])                           # [N, Dout]
                layer_out.append(h)

            # Attention over layers: scores via VPU multiply + reduce.
            # (The attention bias is constant across layers and cancels in the
            #  softmax, so it is omitted here.)
            scores = [jnp.sum(o * watt, keepdims=True) for o in layer_out]  # [1,1]
            m = scores[0]
            for sc in scores[1:]:
                m = jnp.maximum(m, sc)
            exps = [jnp.exp(sc - m) for sc in scores]
            denom = exps[0]
            for e in exps[1:]:
                denom = denom + e
            inv = 1.0 / denom                                                # [1,1]

            out = layer_out[0] * (exps[0] * inv)
            for l in range(1, L):
                out = out + layer_out[l] * (exps[l] * inv)
            o_ref[b] = out.astype(o_ref.dtype)

    return kernel


# ----------------------------------------------------------------------------
# One-time parameter re-layout (hoisted out of the forward path).
# ----------------------------------------------------------------------------
def prepare_evolution_params(params, *, num_nodes: int, max_step: int):
    """Re-layout static weights once for the fused kernel."""
    M = max_step + 1                     # n_supports == 1 per layer
    W_cat = []
    for W in params["W"]:
        Dout, fan_in = W.shape
        F_in = fan_in // M
        # PyTorch flattened feature index is (d*M + m); kernel concatenates the
        # metrics as (m*F_in + d), so permute the Linear weight accordingly.
        W_cat.append(
            W.reshape(Dout, F_in, M).transpose(2, 1, 0).reshape(M * F_in, Dout))
    Dout = params["W"][0].shape[0]
    bias = jnp.stack([b.reshape(1, Dout) for b in params["b"]], axis=0)   # [L,1,Dout]
    W_att_nf = params["W_att"].reshape(num_nodes, Dout)                   # [N, Dout]
    # b_att is intentionally not forwarded: softmax is shift-invariant.
    return {"W_cat": W_cat, "bias": bias, "W_att_nf": W_att_nf}


# ----------------------------------------------------------------------------
# Forward wrapper: single pallas_call, no grid, all operands whole-array VMEM.
# ----------------------------------------------------------------------------
def evolution_cell_forward(x, supports, prepared, *, max_step: int):
    B, N, _ = x.shape
    L = len(prepared["W_cat"])
    Dout = prepared["W_cat"][0].shape[-1]
    kernel = _make_evolution_kernel(B=B, L=L, max_step=max_step)

    vmem = pl.BlockSpec(memory_space=pltpu.MemorySpace.VMEM)
    n_inputs = 1 + L + L + 1 + 1
    return pl.pallas_call(
        kernel,
        out_shape=jax.ShapeDtypeStruct((B, N, Dout), x.dtype),
        in_specs=[vmem] * n_inputs,
        out_specs=vmem,
    )(x, *supports, *prepared["W_cat"], prepared["bias"], prepared["W_att_nf"])


# ----------------------------------------------------------------------------
# Pure-JAX reference (mirrors the PyTorch module) for correctness checking.
# ----------------------------------------------------------------------------
def ref_graphconv(x, support, W, bias, max_step):
    B, N, Din = x.shape
    metrics = [x]
    if max_step > 0:
        x1 = jnp.einsum("mn,bnd->bmd", support, x)
        metrics.append(x1)
        xp2, xp1 = x, x1
        for _ in range(2, max_step + 1):
            x2 = 2.0 * jnp.einsum("mn,bnd->bmd", support, xp1) - xp2
            metrics.append(x2)
            xp2, xp1 = xp1, x2
    X = jnp.stack(metrics, axis=-1)                 # [B, N, Din, M] -> (d*M + m)
    X = X.reshape(B, N, Din * len(metrics))
    return X @ W.T + bias


def ref_evolution_cell(inputs, supports, params, *, max_step):
    x = inputs
    outputs = []
    for i in range(len(params["W"])):
        x = ref_graphconv(x, supports[i], params["W"][i], params["b"][i], max_step)
        outputs.append(x)
    stacked = jnp.stack(outputs, axis=1)            # [B, L, N, F]
    B, L, N, F = stacked.shape
    xf = stacked.reshape(B, L, N * F)
    scores = xf @ params["W_att"].T + params["b_att"]         # [B, L, 1]
    weight = jax.nn.softmax(scores, axis=1)
    return (xf * weight).sum(axis=1).reshape(B, N, F)


if __name__ == "__main__":
    # Model hyper-parameters (small, consistent with the module).
    B = 2
    input_dim = 4
    output_dim = 32
    num_nodes = 16
    n_supports = 1          # EvolutionCell feeds one support per GraphConv_ layer
    max_step = 2
    layer = 2
    num_metrics = max_step * n_supports + 1

    key = jax.random.PRNGKey(0)
    keys = jax.random.split(key, 16)

    # Inputs and supports.
    x = jax.random.normal(keys[0], (B, num_nodes, input_dim), dtype=jnp.float32)
    supports = [
        jax.random.normal(keys[1 + i], (num_nodes, num_nodes), dtype=jnp.float32) * 0.1
        for i in range(layer)
    ]

    # Deterministic parameter init (synthetic; shapes follow the module __init__).
    W_list, b_list = [], []
    for i in range(layer):
        din = input_dim if i == 0 else output_dim
        fan_in = din * num_metrics
        scale = 1.0 / jnp.sqrt(jnp.float32(fan_in))
        W_list.append(
            jax.random.uniform(keys[5 + 2 * i], (output_dim, fan_in),
                               minval=-scale, maxval=scale, dtype=jnp.float32))
        b_list.append(
            jax.random.uniform(keys[6 + 2 * i], (output_dim,),
                               minval=-scale, maxval=scale, dtype=jnp.float32))
    att_in = num_nodes * output_dim
    att_scale = 1.0 / jnp.sqrt(jnp.float32(att_in))
    W_att = jax.random.uniform(keys[12], (1, att_in),
                               minval=-att_scale, maxval=att_scale, dtype=jnp.float32)
    b_att = jax.random.uniform(keys[13], (1,),
                               minval=-att_scale, maxval=att_scale, dtype=jnp.float32)

    params = {"W": W_list, "b": b_list, "W_att": W_att, "b_att": b_att}

    # One-time weight re-layout (hoisted; reused across forward calls).
    prepared = prepare_evolution_params(params, num_nodes=num_nodes,
                                        max_step=max_step)

    out = evolution_cell_forward(x, supports, prepared, max_step=max_step)
    out = jax.block_until_ready(out)

    ref = ref_evolution_cell(x, supports, params, max_step=max_step)
    ref = jax.block_until_ready(ref)

    assert out.shape == (B, num_nodes, output_dim), out.shape
    assert jnp.allclose(out, ref, rtol=1e-4, atol=1e-4), (
        float(jnp.max(jnp.abs(out - ref))))

    print("KERNEL_OK")
</pallas_src>

<mosaic_0001>
module attributes {stable_mosaic.version = 11 : i64} {
  func.func @kernel(%arg0: memref<2x16x4xf32, #tpu.memory_space<vmem>>, %arg1: memref<16x16xf32, #tpu.memory_space<vmem>>, %arg2: memref<16x16xf32, #tpu.memory_space<vmem>>, %arg3: memref<12x32xf32, #tpu.memory_space<vmem>>, %arg4: memref<96x32xf32, #tpu.memory_space<vmem>>, %arg5: memref<2x1x32xf32, #tpu.memory_space<vmem>>, %arg6: memref<16x32xf32, #tpu.memory_space<vmem>>, %arg7: memref<2x16x32xf32, #tpu.memory_space<vmem>>) attributes {dimension_semantics = [], scalar_prefetch = 0 : i64, scratch_operands = 0 : i64, tpu.core_type = #tpu.core_type<tc>} {
    %c0 = arith.constant 0 : index
    %c0_0 = arith.constant 0 : index
    %0 = vector.load %arg6[%c0, %c0_0] : memref<16x32xf32, #tpu.memory_space<vmem>>, vector<16x32xf32>
    %c0_1 = arith.constant 0 : index
    %c0_2 = arith.constant 0 : index
    %c0_3 = arith.constant 0 : index
    %1 = vector.load %arg0[%c0_1, %c0_2, %c0_3] : memref<2x16x4xf32, #tpu.memory_space<vmem>>, vector<1x16x4xf32>
    %2 = vector.shape_cast %1 : vector<1x16x4xf32> to vector<16x4xf32>
    %c0_4 = arith.constant 0 : index
    %c0_5 = arith.constant 0 : index
    %3 = vector.load %arg1[%c0_4, %c0_5] : memref<16x16xf32, #tpu.memory_space<vmem>>, vector<16x16xf32>
    %cst = arith.constant dense<0.000000e+00> : vector<16x4xf32>
    %4 = tpu.matmul %3, %2, %cst {dimension_numbers = #tpu.dot_dimension_numbers<[1], [0], [0], [1], [0, 0, 1, 1], [], []>} : vector<16x16xf32>, vector<16x4xf32>, vector<16x4xf32> -> vector<16x4xf32>
    %cst_6 = arith.constant dense<0.000000e+00> : vector<16x4xf32>
    %5 = tpu.matmul %3, %4, %cst_6 {dimension_numbers = #tpu.dot_dimension_numbers<[1], [0], [0], [1], [0, 0, 1, 1], [], []>} : vector<16x16xf32>, vector<16x4xf32>, vector<16x4xf32> -> vector<16x4xf32>
    %cst_7 = arith.constant 2.000000e+00 : f32
    %6 = vector.broadcast %cst_7 : f32 to vector<16x4xf32>
    %7 = arith.mulf %6, %5 : vector<16x4xf32>
    %8 = arith.subf %7, %2 : vector<16x4xf32>
    %9 = tpu.concatenate %2, %4, %8 in 1 : vector<16x4xf32>, vector<16x4xf32>, vector<16x4xf32> -> vector<16x12xf32>
    %c0_8 = arith.constant 0 : index
    %c0_9 = arith.constant 0 : index
    %10 = vector.load %arg3[%c0_8, %c0_9] : memref<12x32xf32, #tpu.memory_space<vmem>>, vector<12x32xf32>
    %cst_10 = arith.constant dense<0.000000e+00> : vector<16x32xf32>
    %11 = tpu.matmul %9, %10, %cst_10 {dimension_numbers = #tpu.dot_dimension_numbers<[1], [0], [0], [1], [0, 0, 1, 1], [], []>} : vector<16x12xf32>, vector<12x32xf32>, vector<16x32xf32> -> vector<16x32xf32>
    %c0_11 = arith.constant 0 : index
    %c0_12 = arith.constant 0 : index
    %c0_13 = arith.constant 0 : index
    %12 = vector.load %arg5[%c0_11, %c0_12, %c0_13] : memref<2x1x32xf32, #tpu.memory_space<vmem>>, vector<1x1x32xf32>
    %13 = vector.shape_cast %12 : vector<1x1x32xf32> to vector<1x32xf32>
    %14 = vector.broadcast %13 : vector<1x32xf32> to vector<16x32xf32>
    %15 = arith.addf %11, %14 : vector<16x32xf32>
    %c0_14 = arith.constant 0 : index
    %c0_15 = arith.constant 0 : index
    %16 = vector.load %arg2[%c0_14, %c0_15] : memref<16x16xf32, #tpu.memory_space<vmem>>, vector<16x16xf32>
    %cst_16 = arith.constant dense<0.000000e+00> : vector<16x32xf32>
    %17 = tpu.matmul %16, %15, %cst_16 {dimension_numbers = #tpu.dot_dimension_numbers<[1], [0], [0], [1], [0, 0, 1, 1], [], []>} : vector<16x16xf32>, vector<16x32xf32>, vector<16x32xf32> -> vector<16x32xf32>
    %cst_17 = arith.constant dense<0.000000e+00> : vector<16x32xf32>
    %18 = tpu.matmul %16, %17, %cst_17 {dimension_numbers = #tpu.dot_dimension_numbers<[1], [0], [0], [1], [0, 0, 1, 1], [], []>} : vector<16x16xf32>, vector<16x32xf32>, vector<16x32xf32> -> vector<16x32xf32>
    %cst_18 = arith.constant 2.000000e+00 : f32
    %19 = vector.broadcast %cst_18 : f32 to vector<16x32xf32>
    %20 = arith.mulf %19, %18 : vector<16x32xf32>
    %21 = arith.subf %20, %15 : vector<16x32xf32>
    %22 = tpu.concatenate %15, %17, %21 in 1 : vector<16x32xf32>, vector<16x32xf32>, vector<16x32xf32> -> vector<16x96xf32>
    %c0_19 = arith.constant 0 : index
    %c0_20 = arith.constant 0 : index
    %23 = vector.load %arg4[%c0_19, %c0_20] : memref<96x32xf32, #tpu.memory_space<vmem>>, vector<96x32xf32>
    %cst_21 = arith.constant dense<0.000000e+00> : vector<16x32xf32>
    %24 = tpu.matmul %22, %23, %cst_21 {dimension_numbers = #tpu.dot_dimension_numbers<[1], [0], [0], [1], [0, 0, 1, 1], [], []>} : vector<16x96xf32>, vector<96x32xf32>, vector<16x32xf32> -> vector<16x32xf32>
    %c1 = arith.constant 1 : index
    %c0_22 = arith.constant 0 : index
    %c0_23 = arith.constant 0 : index
    %25 = vector.load %arg5[%c1, %c0_22, %c0_23] : memref<2x1x32xf32, #tpu.memory_space<vmem>>, vector<1x1x32xf32>
    %26 = vector.shape_cast %25 : vector<1x1x32xf32> to vector<1x32xf32>
    %27 = vector.broadcast %26 : vector<1x32xf32> to vector<16x32xf32>
    %28 = arith.addf %24, %27 : vector<16x32xf32>
    %29 = arith.mulf %15, %0 : vector<16x32xf32>
    %30 = vector.shape_cast %29 : vector<16x32xf32> to vector<1x16x32xf32>
    %cst_24 = arith.constant dense<0.000000e+00> : vector<1xf32>
    %31 = vector.multi_reduction <add>, %30, %cst_24 [1, 2] : vector<1x16x32xf32> to vector<1xf32>
    %32 = vector.shape_cast %31 : vector<1xf32> to vector<1x1x1xf32>
    %33 = vector.extract %32[0, 0, 0] : f32 from vector<1x1x1xf32>
    %34 = vector.broadcast %33 : f32 to vector<1x1xf32>
    %35 = arith.mulf %28, %0 : vector<16x32xf32>
    %36 = vector.shape_cast %35 : vector<16x32xf32> to vector<1x16x32xf32>
    %cst_25 = arith.constant dense<0.000000e+00> : vector<1xf32>
    %37 = vector.multi_reduction <add>, %36, %cst_25 [1, 2] : vector<1x16x32xf32> to vector<1xf32>
    %38 = vector.shape_cast %37 : vector<1xf32> to vector<1x1x1xf32>
    %39 = vector.extract %38[0, 0, 0] : f32 from vector<1x1x1xf32>
    %40 = vector.broadcast %39 : f32 to vector<1x1xf32>
    %41 = arith.maximumf %34, %40 : vector<1x1xf32>
    %42 = arith.subf %34, %41 : vector<1x1xf32>
    %43 = math.exp %42 : vector<1x1xf32>
    %44 = arith.subf %40, %41 : vector<1x1xf32>
    %45 = math.exp %44 : vector<1x1xf32>
    %46 = arith.addf %43, %45 : vector<1x1xf32>
    %cst_26 = arith.constant 1.000000e+00 : f32
    %47 = vector.broadcast %cst_26 : f32 to vector<1x1xf32>
    %48 = arith.divf %47, %46 : vector<1x1xf32>
    %49 = arith.mulf %43, %48 : vector<1x1xf32>
    %50 = vector.broadcast %49 : vector<1x1xf32> to vector<16x32xf32>
    %51 = arith.mulf %15, %50 : vector<16x32xf32>
    %52 = arith.mulf %45, %48 : vector<1x1xf32>
    %53 = vector.broadcast %52 : vector<1x1xf32> to vector<16x32xf32>
    %54 = arith.mulf %28, %53 : vector<16x32xf32>
    %55 = arith.addf %51, %54 : vector<16x32xf32>
    %c0_27 = arith.constant 0 : index
    %c0_28 = arith.constant 0 : index
    %c0_29 = arith.constant 0 : index
    %56 = vector.load %arg7[%c0_27, %c0_28, %c0_29] : memref<2x16x32xf32, #tpu.memory_space<vmem>>, vector<1x16x32xf32>
    %57 = vector.shape_cast %56 : vector<1x16x32xf32> to vector<16x32xf32>
    %58 = vector.shape_cast %55 : vector<16x32xf32> to vector<1x16x32xf32>
    tpu.vector_store %arg7[%c0_27, %c0_28, %c0_29], %58 {strides = array<i32>} : memref<2x16x32xf32, #tpu.memory_space<vmem>>, vector<1x16x32xf32>,
    %c1_30 = arith.constant 1 : index
    %c0_31 = arith.constant 0 : index
    %c0_32 = arith.constant 0 : index
    %59 = vector.load %arg0[%c1_30, %c0_31, %c0_32] : memref<2x16x4xf32, #tpu.memory_space<vmem>>, vector<1x16x4xf32>
    %60 = vector.shape_cast %59 : vector<1x16x4xf32> to vector<16x4xf32>
    %c0_33 = arith.constant 0 : index
    %c0_34 = arith.constant 0 : index
    %61 = vector.load %arg1[%c0_33, %c0_34] : memref<16x16xf32, #tpu.memory_space<vmem>>, vector<16x16xf32>
    %cst_35 = arith.constant dense<0.000000e+00> : vector<16x4xf32>
    %62 = tpu.matmul %61, %60, %cst_35 {dimension_numbers = #tpu.dot_dimension_numbers<[1], [0], [0], [1], [0, 0, 1, 1], [], []>} : vector<16x16xf32>, vector<16x4xf32>, vector<16x4xf32> -> vector<16x4xf32>
    %cst_36 = arith.constant dense<0.000000e+00> : vector<16x4xf32>
    %63 = tpu.matmul %61, %62, %cst_36 {dimension_numbers = #tpu.dot_dimension_numbers<[1], [0], [0], [1], [0, 0, 1, 1], [], []>} : vector<16x16xf32>, vector<16x4xf32>, vector<16x4xf32> -> vector<16x4xf32>
    %cst_37 = arith.constant 2.000000e+00 : f32
    %64 = vector.broadcast %cst_37 : f32 to vector<16x4xf32>
    %65 = arith.mulf %64, %63 : vector<16x4xf32>
    %66 = arith.subf %65, %60 : vector<16x4xf32>
    %67 = tpu.concatenate %60, %62, %66 in 1 : vector<16x4xf32>, vector<16x4xf32>, vector<16x4xf32> -> vector<16x12xf32>
    %c0_38 = arith.constant 0 : index
    %c0_39 = arith.constant 0 : index
    %68 = vector.load %arg3[%c0_38, %c0_39] : memref<12x32xf32, #tpu.memory_space<vmem>>, vector<12x32xf32>
    %cst_40 = arith.constant dense<0.000000e+00> : vector<16x32xf32>
    %69 = tpu.matmul %67, %68, %cst_40 {dimension_numbers = #tpu.dot_dimension_numbers<[1], [0], [0], [1], [0, 0, 1, 1], [], []>} : vector<16x12xf32>, vector<12x32xf32>, vector<16x32xf32> -> vector<16x32xf32>
    %c0_41 = arith.constant 0 : index
    %c0_42 = arith.constant 0 : index
    %c0_43 = arith.constant 0 : index
    %70 = vector.load %arg5[%c0_41, %c0_42, %c0_43] : memref<2x1x32xf32, #tpu.memory_space<vmem>>, vector<1x1x32xf32>
    %71 = vector.shape_cast %70 : vector<1x1x32xf32> to vector<1x32xf32>
    %72 = vector.broadcast %71 : vector<1x32xf32> to vector<16x32xf32>
    %73 = arith.addf %69, %72 : vector<16x32xf32>
    %c0_44 = arith.constant 0 : index
    %c0_45 = arith.constant 0 : index
    %74 = vector.load %arg2[%c0_44, %c0_45] : memref<16x16xf32, #tpu.memory_space<vmem>>, vector<16x16xf32>
    %cst_46 = arith.constant dense<0.000000e+00> : vector<16x32xf32>
    %75 = tpu.matmul %74, %73, %cst_46 {dimension_numbers = #tpu.dot_dimension_numbers<[1], [0], [0], [1], [0, 0, 1, 1], [], []>} : vector<16x16xf32>, vector<16x32xf32>, vector<16x32xf32> -> vector<16x32xf32>
    %cst_47 = arith.constant dense<0.000000e+00> : vector<16x32xf32>
    %76 = tpu.matmul %74, %75, %cst_47 {dimension_numbers = #tpu.dot_dimension_numbers<[1], [0], [0], [1], [0, 0, 1, 1], [], []>} : vector<16x16xf32>, vector<16x32xf32>, vector<16x32xf32> -> vector<16x32xf32>
    %cst_48 = arith.constant 2.000000e+00 : f32
    %77 = vector.broadcast %cst_48 : f32 to vector<16x32xf32>
    %78 = arith.mulf %77, %76 : vector<16x32xf32>
    %79 = arith.subf %78, %73 : vector<16x32xf32>
    %80 = tpu.concatenate %73, %75, %79 in 1 : vector<16x32xf32>, vector<16x32xf32>, vector<16x32xf32> -> vector<16x96xf32>
    %c0_49 = arith.constant 0 : index
    %c0_50 = arith.constant 0 : index
    %81 = vector.load %arg4[%c0_49, %c0_50] : memref<96x32xf32, #tpu.memory_space<vmem>>, vector<96x32xf32>
    %cst_51 = arith.constant dense<0.000000e+00> : vector<16x32xf32>
    %82 = tpu.matmul %80, %81, %cst_51 {dimension_numbers = #tpu.dot_dimension_numbers<[1], [0], [0], [1], [0, 0, 1, 1], [], []>} : vector<16x96xf32>, vector<96x32xf32>, vector<16x32xf32> -> vector<16x32xf32>
    %c1_52 = arith.constant 1 : index
    %c0_53 = arith.constant 0 : index
    %c0_54 = arith.constant 0 : index
    %83 = vector.load %arg5[%c1_52, %c0_53, %c0_54] : memref<2x1x32xf32, #tpu.memory_space<vmem>>, vector<1x1x32xf32>
    %84 = vector.shape_cast %83 : vector<1x1x32xf32> to vector<1x32xf32>
    %85 = vector.broadcast %84 : vector<1x32xf32> to vector<16x32xf32>
    %86 = arith.addf %82, %85 : vector<16x32xf32>
    %87 = arith.mulf %73, %0 : vector<16x32xf32>
    %88 = vector.shape_cast %87 : vector<16x32xf32> to vector<1x16x32xf32>
    %cst_55 = arith.constant dense<0.000000e+00> : vector<1xf32>
    %89 = vector.multi_reduction <add>, %88, %cst_55 [1, 2] : vector<1x16x32xf32> to vector<1xf32>
    %90 = vector.shape_cast %89 : vector<1xf32> to vector<1x1x1xf32>
    %91 = vector.extract %90[0, 0, 0] : f32 from vector<1x1x1xf32>
    %92 = vector.broadcast %91 : f32 to vector<1x1xf32>
    %93 = arith.mulf %86, %0 : vector<16x32xf32>
    %94 = vector.shape_cast %93 : vector<16x32xf32> to vector<1x16x32xf32>
    %cst_56 = arith.constant dense<0.000000e+00> : vector<1xf32>
    %95 = vector.multi_reduction <add>, %94, %cst_56 [1, 2] : vector<1x16x32xf32> to vector<1xf32>
    %96 = vector.shape_cast %95 : vector<1xf32> to vector<1x1x1xf32>
    %97 = vector.extract %96[0, 0, 0] : f32 from vector<1x1x1xf32>
    %98 = vector.broadcast %97 : f32 to vector<1x1xf32>
    %99 = arith.maximumf %92, %98 : vector<1x1xf32>
    %100 = arith.subf %92, %99 : vector<1x1xf32>
    %101 = math.exp %100 : vector<1x1xf32>
    %102 = arith.subf %98, %99 : vector<1x1xf32>
    %103 = math.exp %102 : vector<1x1xf32>
    %104 = arith.addf %101, %103 : vector<1x1xf32>
    %cst_57 = arith.constant 1.000000e+00 : f32
    %105 = vector.broadcast %cst_57 : f32 to vector<1x1xf32>
    %106 = arith.divf %105, %104 : vector<1x1xf32>
    %107 = arith.mulf %101, %106 : vector<1x1xf32>
    %108 = vector.broadcast %107 : vector<1x1xf32> to vector<16x32xf32>
    %109 = arith.mulf %73, %108 : vector<16x32xf32>
    %110 = arith.mulf %103, %106 : vector<1x1xf32>
    %111 = vector.broadcast %110 : vector<1x1xf32> to vector<16x32xf32>
    %112 = arith.mulf %86, %111 : vector<16x32xf32>
    %113 = arith.addf %109, %112 : vector<16x32xf32>
    %c1_58 = arith.constant 1 : index
    %c0_59 = arith.constant 0 : index
    %c0_60 = arith.constant 0 : index
    %114 = vector.load %arg7[%c1_58, %c0_59, %c0_60] : memref<2x16x32xf32, #tpu.memory_space<vmem>>, vector<1x16x32xf32>
    %115 = vector.shape_cast %114 : vector<1x16x32xf32> to vector<16x32xf32>
    %116 = vector.shape_cast %113 : vector<16x32xf32> to vector<1x16x32xf32>
    tpu.vector_store %arg7[%c1_58, %c0_59, %c0_60], %116 {strides = array<i32>} : memref<2x16x32xf32, #tpu.memory_space<vmem>>, vector<1x16x32xf32>,
    return
  }
}

</mosaic_0001>

<bundles_post_ra>
// kernel: tpu_custom_call.1
= control target key start
LH: loop header
LB: loop body
LE: loop exit
PB: predicated region body
PF: predicated region fallthrough
CT: control target
= control target key end

     0   :  { %vm33_vm0 = vcmask 130048   ;;  %s1892_s0 = inlined_call_operand.vmem [shape: f32[2,16,4], index: 0, kind: input, shape index: {}]   ;;  %s1893_s1 = inlined_call_operand.vmem [shape: f32[16,16], index: 1, kind: input, shape index: {}]   ;;  %s1894_s2 = inlined_call_operand.vmem [shape: f32[16,16], index: 2, kind: input, shape index: {}]   ;;  %s1895_s3 = inlined_call_operand.vmem [shape: f32[12,32], index: 3, kind: input, shape index: {}]   ;;  %s1896_s4 = inlined_call_operand.vmem [shape: f32[96,32], index: 4, kind: input, shape index: {}]   ;;  %s1897_s5 = inlined_call_operand.vmem [shape: f32[2,1,32], index: 5, kind: input, shape index: {}]   ;;  %s1898_s6 = inlined_call_operand.vmem [shape: f32[16,32], index: 6, kind: input, shape index: {}]   ;;  %s1899_s7 = inlined_call_operand.hbm [shape: f32[2,16,32], index: 7, kind: output, shape index: {}]  }
   0x1   :  { %v1693_v0 = vld [vmem:[%s1892_s0] sm:$0xff]  ;;  %v1698_v1 = vld [vmem:[%s1892_s0 + $0x8] sm:$0xff]  ;;  %v1703_v2 = vld [vmem:[%s1892_s0 + $0x10] sm:$0xff] }
   0x2   :  { %v1500_v3 = vpack.c.bf16 %v1698_v1, %v1693_v0  ;;  %v1710_v4 = vld [vmem:[%s1892_s0 + $0x18] sm:$0xff]  ;;  %v31_v5 = vld [vmem:[%s1893_s1] sm:$0xff] }
   0x3   :  { %v1546_v6 = vpack.c.bf16 %v1710_v4, %v1703_v2  ;;  %1380 = vmatprep.mubr.msk.f32.mxu1 %vm33_vm0, %v31_v5  ;;  %1442 = vmatprep.mubr.msk.f32.mxu0 %vm33_vm0, %v31_v5 }
   0x4   :  { %12 = vsyncpa [#allocation3], 0  ;;  %1501 = vmatprep.subr.bf16.mxu1 %v1500_v3  ;;  %v32_v7 = vld [vmem:[%s1893_s1 + $0x8] sm:$0xff]  ;;  %s1643_s0 = smov 4   ;;  %v216_v14 = vld [vmem:[%s1895_s3] sm:$0xff]  ;;  %vm232_vm1 = vcmask 1043456  }
   0x5   :  { %1547 = vmatprep.subr.bf16.mxu0 %v1546_v6  ;;  %1503 = vmatpush3.bf16.msra.mxu1 %v1500_v3  ;;  %v217_v15 = vld [vmem:[%s1895_s3 + $0x8] sm:$0xf]  ;;  %vm1644_vm2 = vmmov 1   ;;  %s1645_s18 = smov 8   ;;  %vm210_vm4 = vcmask 31744   ;;  %vm213_vm5 = vcmask 64512  }
   0x6   :  { %1549 = vmatpush3.bf16.msra.mxu0 %v1546_v6  ;;  %v1508_v16 = vpack.c.bf16 %v217_v15, %v216_v14  ;;  %vm1509_vm3 = vmpackc.low %vm232_vm1, %vm1644_vm2  ;;  %v833_v17 = vld [vmem:[%s1895_s3 + $0x8] sm:$0xf]  ;;  %vm225_vm6 = vcmask 97280   ;;  %v311_v47 = vld [vmem:[%s1894_s2] sm:$0xff]  ;;  %vm489_vm7 = vcmask 261120   ;;  %vm492_vm8 = vcmask 523264  }
   0x7   :  { %v1554_v18 = vpack.c.bf16 %v833_v17, %v216_v14  ;;  %v1278_v48 = vld [vmem:[%s1897_s5] ss:$0 sm:$0xff]  ;;  %v312_v55 = vld [vmem:[%s1894_s2 + $0x8] sm:$0xff]  ;;  %s1646_s2 = smov 32   ;;  %v498_v6 = vld [vmem:[%s1896_s4 + $0x18] sm:$0xff]  ;;  %vm515_vm9 = vcmask 785408  }
   0x8   :  { %1381 = vmatmul.mubr.msk.f32.vlgmr.msra.gmra.mrb[0].mxu1 %vm33_vm0, %v32_v7  ;;  %v496_v3 = vld [vmem:[%s1896_s4 + $0x8] sm:$0xff]  ;;  %v503_v14 = vld [vmem:[%s1896_s4 + $0x40] sm:$0xff]  ;;  %v505_v17 = vld [vmem:[%s1896_s4 + $0x50] sm:$0xff]  ;;  %s1648_s30 = smov [#allocation2]  }
   0x9   :  { %1443 = vmatmul.mubr.msk.f32.vlgmr.msra.gmra.mrb[0].mxu0 %vm33_vm0, %v32_v7  ;;  %1387 = vmatprep.mubr.msk.f32.mxu1 %vm33_vm0, %v31_v5  ;;  %v504_v15 = vld [vmem:[%s1896_s4 + $0x48] sm:$0xff]  ;;  %s1263_s8 = sshll.u32 %s1648_s30, 4  ;;  %s1264_s8 = int_to_ptr.vmem [resolvable:$true] %s1263_s8 }
   0xa   :  { %1449 = vmatprep.mubr.msk.f32.mxu0 %vm33_vm0, %v31_v5  ;;  %s1619_s9 = scalar_lea.vmem %s1264_s8, 512  ;;  %p1624_p1 = scmp.lt.s32.totalorder %s1264_s8, %s1264_s8 }
   0xb   :  { %p1620_p0 = scmp.ne.s32.totalorder %s1264_s8, %s1619_s9  ;;  %p1625_p2 = scmp.lt.s32.totalorder %s1619_s9, %s1619_s9 }
   0xd   :  { %p1626_p3 = por %p1625_p2, %p1624_p1 }
   0xf   :  { %p1627_p4 = pnand %p1626_p3, %p1620_p0 }
  0xdb   :  { %v1382_v8 = vpop.f32.mrb[0].mxu1 }
  0xdc   :  { %v1444_v9 = vpop.f32.mrb[0].mxu0  ;;  %198 = vrot.lane.b32.xlu1 %v1382_v8, %s1643_s0  ;;  %v106_v10 = vpop.f32.mrb[1].mxu1 }
  0xdd   :  { %816 = vrot.lane.b32.xlu0 %v1444_v9, %s1643_s0  ;;  %v1504_v11 = vpack.c.bf16 %v1382_v8, %v106_v10  ;;  %v724_v12 = vpop.f32.mrb[1].mxu0  ;;  %v499_v8 = vld [vmem:[%s1896_s4 + $0x20] sm:$0xff] }
  0xde   :  { %v1550_v13 = vpack.c.bf16 %v1444_v9, %v724_v12  ;;  %v500_v9 = vld [vmem:[%s1896_s4 + $0x28] sm:$0xff] }
  0xdf   :  { %1505 = vmatprep.subr.bf16.mxu1 %v1504_v11 }
  0xe0   :  { %1507 = vmatpush3.bf16.msra.mxu1 %v1504_v11  ;;  %1551 = vmatprep.subr.bf16.mxu0 %v1550_v13  ;;  %v501_v11 = vld [vmem:[%s1896_s4 + $0x30] sm:$0xff] }
  0xe1   :  { %196 = vrot.lane.b32.xlu0 %v106_v10, %s1643_s0  ;;  %1553 = vmatpush3.bf16.msra.mxu0 %v1550_v13  ;;  %v1530_v10 = vpack.c.bf16 %v500_v9, %v499_v8 }
  0xe2   :  { %1510 = vmatprep.subr.msk.bf16.mxu1 %vm1509_vm3, %v1508_v16  ;;  %1556 = vmatprep.subr.msk.bf16.mxu0 %vm1509_vm3, %v1554_v18 }
  0xe3   :  { %1388 = vmatmul.mubr.msk.f32.vlgmr.msra.gmra.mrb[2].mxu1 %vm33_vm0, %v32_v7 }
  0xe4   :  { %1450 = vmatmul.mubr.msk.f32.vlgmr.msra.gmra.mrb[2].mxu0 %vm33_vm0, %v32_v7  ;;  %1513 = vmatpush3.bf16.msk.msra.mxu1 %vm1509_vm3, %v1508_v16  ;;  %v1538_v16 = vpack.c.bf16 %v504_v15, %v503_v14 }
  0xe5   :  { %814 = vrot.lane.b32.xlu0 %v724_v12, %s1643_s0  ;;  %1559 = vmatpush3.bf16.msk.msra.mxu0 %vm1509_vm3, %v1554_v18  ;;  %v502_v12 = vld [vmem:[%s1896_s4 + $0x38] sm:$0xff] }
  0xe6   :  { %v1534_v13 = vpack.c.bf16 %v502_v12, %v501_v11  ;;  %v506_v18 = vld [vmem:[%s1896_s4 + $0x58] sm:$0xff] }
 0x14e   :  { %v199_v34 = vpop.permute.xlu1 %198 }
 0x14f   :  { %v817_v31 = vpop.permute.xlu0 %816  ;;  %v212_v38 = vsel %vm210_vm4, %v1698_v1, %v199_v34 }
 0x150   :  { %v829_v44 = vsel %vm210_vm4, %v1710_v4, %v817_v31 }
 0x153   :  { %v197_v32 = vpop.permute.xlu0 %196 }
 0x154   :  { %v211_v36 = vsel %vm210_vm4, %v1693_v0, %v197_v32  ;;  %v27_v32 = vld [vmem:[%s1898_s6] sm:$0xff] }
 0x157   :  { %v815_v33 = vpop.permute.xlu0 %814 }
 0x158   :  { %v828_v41 = vsel %vm210_vm4, %v1703_v2, %v815_v33  ;;  %v28_v33 = vld [vmem:[%s1898_s6 + $0x8] sm:$0xff] }
 0x1b6   :  { %v1389_v19 = vpop.f32.mrb[2].mxu1 }
 0x1b7   :  { %v191_v20 = vmul.f32 2.0, %v1389_v19  ;;  %v181_v21 = vpop.f32.mrb[3].mxu1  ;;  %v1451_v22 = vpop.f32.mrb[2].mxu0  ;;  %v1542_v19 = vpack.c.bf16 %v506_v18, %v505_v17 }
 0x1b8   :  { %v190_v23 = vmul.f32 2.0, %v181_v21  ;;  %v799_v24 = vpop.f32.mrb[3].mxu0  ;;  %v809_v29 = vmul.f32 2.0, %v1451_v22 }
 0x1b9   :  { %v193_v25 = vsub.f32 %v191_v20, %v1698_v1  ;;  %v808_v26 = vmul.f32 2.0, %v799_v24 }
 0x1ba   :  { %v192_v27 = vsub.f32 %v190_v23, %v1693_v0  ;;  %v811_v30 = vsub.f32 %v809_v29, %v1710_v4  ;;  %v497_v4 = vld [vmem:[%s1896_s4 + $0x10] sm:$0xff] }
 0x1bb   :  { %206 = vrot.lane.b32.xlu0 %v193_v25, %s1645_s18  ;;  %v810_v28 = vsub.f32 %v808_v26, %v1703_v2  ;;  %v495_v2 = vld [vmem:[%s1896_s4] sm:$0xff]  ;;  %v1526_v7 = vpack.c.bf16 %v498_v6, %v497_v4  ;;  %s1647_s4 = smov 64  }
 0x1bc   :  { %204 = vrot.lane.b32.xlu1 %v192_v27, %s1645_s18  ;;  %v1522_v5 = vpack.c.bf16 %v496_v3, %v495_v2 }
 0x1c0   :  { %822 = vrot.lane.b32.xlu1 %v810_v28, %s1645_s18 }
 0x1c4   :  { %824 = vrot.lane.b32.xlu1 %v811_v30, %s1645_s18 }
 0x22d   :  { %v207_v35 = vpop.permute.xlu0 %206 }
 0x22e   :  { %v205_v37 = vpop.permute.xlu1 %204  ;;  %v215_v40 = vsel %vm213_vm5, %v212_v38, %v207_v35 }
 0x22f   :  { %v214_v39 = vsel %vm213_vm5, %v211_v36, %v205_v37 }
 0x230   :  { %1394 = vmatprep.mubr.msk.f32.mxu1 %vm225_vm6, %v214_v39 }
 0x231   :  { %1395 = vmatmul.mubr.msk.f32.vlgmr.msra.gmra.mrb[4].mxu1 %vm225_vm6, %v215_v40 }
 0x232   :  { %v823_v42 = vpop.permute.xlu1 %822  ;;  %1401 = vmatprep.mubr.msk.f32.mxu1 %vm33_vm0, %v311_v47 }
 0x233   :  { %v830_v43 = vsel %vm213_vm5, %v828_v41, %v823_v42 }
 0x234   :  { %1456 = vmatprep.mubr.msk.f32.mxu0 %vm225_vm6, %v830_v43 }
 0x236   :  { %v825_v45 = vpop.permute.xlu1 %824 }
 0x237   :  { %v831_v46 = vsel %vm213_vm5, %v829_v44, %v825_v45 }
 0x238   :  { %1457 = vmatmul.mubr.msk.f32.vlgmr.msra.gmra.mrb[4].mxu0 %vm225_vm6, %v831_v46 }
 0x239   :  { %1463 = vmatprep.mubr.msk.f32.mxu0 %vm33_vm0, %v311_v47 }
 0x304   :  { %v1396_v49 = vpop.f32.mrb[4].mxu1 }
 0x305   :  { %v1761_v50 = vadd.f32 %v1396_v49, %v1278_v48  ;;  %v302_v51 = vpop.f32.mrb[5].mxu1 }
 0x306   :  { %v1763_v52 = vadd.f32 %v1278_v48, %v302_v51 }
 0x307   :  { %v598_v35 = vmul.f32 %v1761_v50, %v28_v33 }
 0x308   :  { %v1514_v53 = vpack.c.bf16 %v1761_v50, %v1763_v52  ;;  %v597_v34 = vmul.f32 %v1763_v52, %v27_v32 }
 0x309   :  { %v600_v37 = vsel %vm489_vm7, %v598_v35, 0.0 }
 0x30a   :  { %1515 = vmatprep.subr.bf16.mxu1 %v1514_v53  ;;  %v599_v36 = vsel %vm489_vm7, %v597_v34, 0.0 }
 0x30b   :  { %1517 = vmatpush3.bf16.msra.mxu1 %v1514_v53  ;;  %v1458_v54 = vpop.f32.mrb[4].mxu0  ;;  %v601_v40 = vadd.f32 %v600_v37, %v599_v36 }
 0x30c   :  { %v1770_v56 = vadd.f32 %v1458_v54, %v1278_v48  ;;  %v916_v57 = vpop.f32.mrb[5].mxu0 }
 0x30d   :  { %v1772_v58 = vadd.f32 %v1278_v48, %v916_v57 }
 0x30e   :  { %1402 = vmatmul.mubr.msk.f32.vlgmr.msra.gmra.mrb[6].mxu1 %vm33_vm0, %v312_v55  ;;  %v1208_v39 = vmul.f32 %v1770_v56, %v28_v33 }
 0x30f   :  { %v1560_v59 = vpack.c.bf16 %v1770_v56, %v1772_v58  ;;  %1408 = vmatprep.mubr.msk.f32.mxu1 %vm33_vm0, %v311_v47  ;;  %v1207_v38 = vmul.f32 %v1772_v58, %v27_v32 }
 0x310   :  { %v1210_v42 = vsel %vm489_vm7, %v1208_v39, 0.0 }
 0x311   :  { %1561 = vmatprep.subr.bf16.mxu0 %v1560_v59  ;;  %v1209_v41 = vsel %vm489_vm7, %v1207_v38, 0.0 }
 0x312   :  { %1563 = vmatpush3.bf16.msra.mxu0 %v1560_v59  ;;  %v1211_v43 = vadd.f32 %v1210_v42, %v1209_v41 }
 0x315   :  { %1464 = vmatmul.mubr.msk.f32.vlgmr.msra.gmra.mrb[6].mxu0 %vm33_vm0, %v312_v55 }
 0x316   :  { %1470 = vmatprep.mubr.msk.f32.mxu0 %vm33_vm0, %v311_v47 }
 0x3e1   :  { %v1403_v60 = vpop.f32.mrb[6].mxu1 }
 0x3e2   :  { %477 = vrot.lane.b32.xlu0 %v1403_v60, %s1646_s2  ;;  %v385_v61 = vpop.f32.mrb[7].mxu1 }
 0x3e3   :  { %v1518_v62 = vpack.c.bf16 %v1403_v60, %v385_v61 }
 0x3e5   :  { %1519 = vmatprep.subr.bf16.mxu1 %v1518_v62 }
 0x3e6   :  { %1521 = vmatpush3.bf16.msra.mxu1 %v1518_v62 }
 0x3e7   :  { %1523 = vmatprep.subr.bf16.mxu1 %v1522_v5 }
 0x3e8   :  { %v1465_v63 = vpop.f32.mrb[6].mxu0 }
 0x3e9   :  { %1409 = vmatmul.mubr.msk.f32.vlgmr.msra.gmra.mrb[8].mxu1 %vm33_vm0, %v312_v55  ;;  %1091 = vrot.lane.b32.xlu0 %v1465_v63, %s1646_s2  ;;  %v999_v0 = vpop.f32.mrb[7].mxu0 }
 0x3ea   :  { %v1564_v1 = vpack.c.bf16 %v1465_v63, %v999_v0  ;;  %1089 = vrot.lane.b32.xlu1 %v999_v0, %s1646_s2  ;;  %1525 = vmatpush3.bf16.msra.mxu1 %v1522_v5 }
 0x3eb   :  { %1527 = vmatprep.subr.bf16.mxu1 %v1526_v7 }
 0x3ec   :  { %1565 = vmatprep.subr.bf16.mxu0 %v1564_v1 }
 0x3ed   :  { %475 = vrot.lane.b32.xlu0 %v385_v61, %s1646_s2  ;;  %1567 = vmatpush3.bf16.msra.mxu0 %v1564_v1 }
 0x3ee   :  { %1569 = vmatprep.subr.bf16.mxu0 %v1522_v5  ;;  %1529 = vmatpush3.bf16.msra.mxu1 %v1526_v7 }
 0x3ef   :  { %1531 = vmatprep.subr.bf16.mxu1 %v1530_v10 }
 0x3f0   :  { %1471 = vmatmul.mubr.msk.f32.vlgmr.msra.gmra.mrb[8].mxu0 %vm33_vm0, %v312_v55 }
 0x3f1   :  { %1571 = vmatpush3.bf16.msra.mxu0 %v1522_v5 }
 0x3f2   :  { %1573 = vmatprep.subr.bf16.mxu0 %v1526_v7  ;;  %1533 = vmatpush3.bf16.msra.mxu1 %v1530_v10 }
 0x3f3   :  { %1535 = vmatprep.subr.bf16.mxu1 %v1534_v13 }
 0x3f5   :  { %1575 = vmatpush3.bf16.msra.mxu0 %v1526_v7  ;;  %v1287_v7 = vld [vmem:[%s1897_s5 + $0x1] ss:$0 sm:$0xff] }
 0x3f6   :  { %1577 = vmatprep.subr.bf16.mxu0 %v1530_v10  ;;  %1537 = vmatpush3.bf16.msra.mxu1 %v1534_v13 }
 0x3f7   :  { %1539 = vmatprep.subr.bf16.mxu1 %v1538_v16 }
 0x3f9   :  { %1579 = vmatpush3.bf16.msra.mxu0 %v1530_v10 }
 0x3fa   :  { %1581 = vmatprep.subr.bf16.mxu0 %v1534_v13  ;;  %1541 = vmatpush3.bf16.msra.mxu1 %v1538_v16 }
 0x3fb   :  { %1543 = vmatprep.subr.bf16.mxu1 %v1542_v19 }
 0x3fd   :  { %1583 = vmatpush3.bf16.msra.mxu0 %v1534_v13 }
 0x3fe   :  { %1585 = vmatprep.subr.bf16.mxu0 %v1538_v16  ;;  %1545 = vmatpush3.bf16.msra.mxu1 %v1542_v19 }
 0x401   :  { %1587 = vmatpush3.bf16.msra.mxu0 %v1538_v16 }
 0x402   :  { %1589 = vmatprep.subr.bf16.mxu0 %v1542_v19 }
 0x405   :  { %1591 = vmatpush3.bf16.msra.mxu0 %v1542_v19 }
 0x454   :  { %v478_v44 = vpop.permute.xlu0 %477 }
 0x455   :  { %v491_v53 = vsel %vm489_vm7, %v1761_v50, %v478_v44 }
 0x45b   :  { %v1092_v45 = vpop.permute.xlu0 %1091 }
 0x45c   :  { %v1090_v47 = vpop.permute.xlu1 %1089  ;;  %v1104_v61 = vsel %vm489_vm7, %v1770_v56, %v1092_v45 }
 0x45d   :  { %v1103_v57 = vsel %vm489_vm7, %v1772_v58, %v1090_v47 }
 0x45f   :  { %v476_v46 = vpop.permute.xlu0 %475 }
 0x460   :  { %v490_v49 = vsel %vm489_vm7, %v1763_v52, %v476_v46 }
 0x4bc   :  { %v1410_v20 = vpop.f32.mrb[8].mxu1 }
 0x4bd   :  { %v470_v21 = vmul.f32 2.0, %v1410_v20  ;;  %v460_v22 = vpop.f32.mrb[9].mxu1 }
 0x4be   :  { %v469_v23 = vmul.f32 2.0, %v460_v22 }
 0x4bf   :  { %v472_v24 = vsub.f32 %v470_v21, %v1761_v50 }
 0x4c0   :  { %v471_v25 = vsub.f32 %v469_v23, %v1763_v52 }
 0x4c1   :  { %485 = vrot.lane.b32.xlu0 %v472_v24, %s1647_s4 }
 0x4c2   :  { %483 = vrot.lane.b32.xlu1 %v471_v25, %s1647_s4 }
 0x4c3   :  { %v1472_v26 = vpop.f32.mrb[8].mxu0 }
 0x4c4   :  { %v1074_v27 = vpop.f32.mrb[9].mxu0  ;;  %v1084_v29 = vmul.f32 2.0, %v1472_v26 }
 0x4c5   :  { %v1083_v28 = vmul.f32 2.0, %v1074_v27 }
 0x4c6   :  { %v1086_v31 = vsub.f32 %v1084_v29, %v1770_v56 }
 0x4c7   :  { %v1085_v30 = vsub.f32 %v1083_v28, %v1772_v58 }
 0x4c9   :  { %1097 = vrot.lane.b32.xlu1 %v1085_v30, %s1647_s4 }
 0x4cd   :  { %1099 = vrot.lane.b32.xlu1 %v1086_v31, %s1647_s4 }
 0x4e0   :  { %602 = vadd.xlane.f32.xlu0 %v601_v40 }
 0x4e4   :  { %1212 = vadd.xlane.f32.xlu0 %v1211_v43 }
 0x533   :  { %v486_v48 = vpop.permute.xlu0 %485 }
 0x534   :  { %v484_v51 = vpop.permute.xlu1 %483  ;;  %v494_v55 = vsel %vm492_vm8, %v491_v53, %v486_v48 }
 0x535   :  { %v493_v54 = vsel %vm492_vm8, %v490_v49, %v484_v51 }
 0x536   :  { %1435 = vmatprep.mubr.msk.f32.mxu1 %vm515_vm9, %v493_v54 }
 0x537   :  { %1436 = vmatmul.mubr.msk.f32.vlgmr.msra.gmra.mrb[10].mxu1 %vm515_vm9, %v494_v55 }
 0x53b   :  { %v1098_v59 = vpop.permute.xlu1 %1097 }
 0x53c   :  { %v1105_v60 = vsel %vm492_vm8, %v1103_v57, %v1098_v59 }
 0x53d   :  { %1497 = vmatprep.mubr.msk.f32.mxu0 %vm515_vm9, %v1105_v60 }
 0x53f   :  { %v1100_v62 = vpop.permute.xlu1 %1099 }
 0x540   :  { %v1106_v63 = vsel %vm492_vm8, %v1104_v61, %v1100_v62 }
 0x541   :  { %1498 = vmatmul.mubr.msk.f32.vlgmr.msra.gmra.mrb[10].mxu0 %vm515_vm9, %v1106_v63 }
 0x56d   :  { %v603_v0 = vpop.xlane.xlu0 %602 }
 0x56e   :  { %v604_v1 = vrot.slane %v603_v0, 4 }
 0x570   :  { %v605_v2 = vadd.f32 %v604_v1, %v603_v0 }
 0x571   :  { %v1213_v26 = vpop.xlane.xlu0 %1212 }
 0x572   :  { %v606_v3 = vrot.slane %v605_v2, 2  ;;  %v1214_v27 = vrot.slane %v1213_v26, 4 }
 0x574   :  { %v607_v4 = vadd.f32 %v606_v3, %v605_v2  ;;  %v1215_v28 = vadd.f32 %v1214_v27, %v1213_v26 }
 0x576   :  { %v608_v5 = vrot.slane %v607_v4, 1  ;;  %v1216_v29 = vrot.slane %v1215_v28, 2 }
 0x578   :  { %v609_v6 = vadd.f32 %v608_v5, %v607_v4  ;;  %v1217_v35 = vadd.f32 %v1216_v29, %v1215_v28 }
 0x57a   :  { %1592 = vpush %v609_v6  ;;  %v1218_v38 = vrot.slane %v1217_v35, 1 }
 0x57c   :  { %v1219_v41 = vadd.f32 %v1218_v38, %v1217_v35 }
 0x5ab   :  { %s1593_s5 = spop %1592 }
 0x5ac   :  { %v611_v47 = vstv %s1593_s5 }
 0x60a   :  { %v1437_v8 = vpop.f32.mrb[10].mxu1 }
 0x60b   :  { %v1851_v9 = vadd.f32 %v1437_v8, %v1287_v7  ;;  %v588_v10 = vpop.f32.mrb[11].mxu1 }
 0x60c   :  { %v1853_v11 = vadd.f32 %v1287_v7, %v588_v10 }
 0x60d   :  { %v613_v12 = vmul.f32 %v1851_v9, %v28_v33 }
 0x60e   :  { %v612_v13 = vmul.f32 %v1853_v11, %v27_v32 }
 0x60f   :  { %v615_v14 = vsel %vm489_vm7, %v613_v12, 0.0 }
 0x610   :  { %v614_v15 = vsel %vm489_vm7, %v612_v13, 0.0 }
 0x611   :  { %v616_v16 = vadd.f32 %v615_v14, %v614_v15 }
 0x613   :  { %617 = vadd.xlane.f32.xlu1 %v616_v16 }
 0x614   :  { %v1499_v17 = vpop.f32.mrb[10].mxu0 }
 0x615   :  { %v1859_v18 = vadd.f32 %v1499_v17, %v1287_v7  ;;  %v1198_v19 = vpop.f32.mrb[11].mxu0 }
 0x616   :  { %v1861_v20 = vadd.f32 %v1287_v7, %v1198_v19 }
 0x617   :  { %v1223_v21 = vmul.f32 %v1859_v18, %v28_v33 }
 0x618   :  { %v1222_v22 = vmul.f32 %v1861_v20, %v27_v32 }
 0x619   :  { %v1225_v23 = vsel %vm489_vm7, %v1223_v21, 0.0 }
 0x61a   :  { %v1224_v24 = vsel %vm489_vm7, %v1222_v22, 0.0 }
 0x61b   :  { %v1226_v25 = vadd.f32 %v1225_v23, %v1224_v24 }
 0x61d   :  { %1227 = vadd.xlane.f32.xlu0 %v1226_v25 }
 0x6a0   :  { %v618_v30 = vpop.xlane.xlu1 %617 }
 0x6a1   :  { %v619_v31 = vrot.slane %v618_v30, 4 }
 0x6a3   :  { %v620_v34 = vadd.f32 %v619_v31, %v618_v30 }
 0x6a5   :  { %v621_v36 = vrot.slane %v620_v34, 2 }
 0x6a7   :  { %v622_v37 = vadd.f32 %v621_v36, %v620_v34 }
 0x6a9   :  { %v623_v33 = vrot.slane %v622_v37, 1 }
 0x6aa   :  { %v1228_v39 = vpop.xlane.xlu0 %1227 }
 0x6ab   :  { %v1229_v32 = vrot.slane %v1228_v39, 4  ;;  %v624_v40 = vadd.f32 %v623_v33, %v622_v37 }
 0x6ad   :  { %v1230_v42 = vadd.f32 %v1229_v32, %v1228_v39  ;;  %1594 = vpush %v624_v40 }
 0x6ae   :  { %1596 = vpush %v1219_v41 }
 0x6af   :  { %v1231_v43 = vrot.slane %v1230_v42, 2 }
 0x6b1   :  { %v1232_v44 = vadd.f32 %v1231_v43, %v1230_v42 }
 0x6b3   :  { %v1233_v45 = vrot.slane %v1232_v44, 1 }
 0x6b5   :  { %v1234_v46 = vadd.f32 %v1233_v45, %v1232_v44 }
 0x6b7   :  { %1598 = vpush %v1234_v46 }
 0x6de   :  { %s1595_s27 = spop %1594 }
 0x6df   :  { %v626_v48 = vstv %s1595_s27  ;;  %s1597_s28 = spop %1596 }
 0x6e0   :  { %v627_v49 = vmax.f32 %v611_v47, %v626_v48  ;;  %v1221_v57 = vstv %s1597_s28 }
 0x6e2   :  { %v628_v51 = vsub.f32 %v611_v47, %v627_v49  ;;  %v631_v53 = vsub.f32 %v626_v48, %v627_v49 }
 0x6e4   :  { %v629_v54 = vmul.f32 1.442695, %v628_v51  ;;  %v632_v55 = vmul.f32 1.442695, %v631_v53 }
 0x6e6   :  { %1607 = vpow2.f32 %v629_v54 }
 0x6e7   :  { %1609 = vpow2.f32 %v632_v55 }
 0x6e8   :  { %s1599_s29 = spop %1598 }
 0x6e9   :  { %v1236_v59 = vstv %s1599_s29 }
 0x6ea   :  { %v1237_v60 = vmax.f32 %v1221_v57, %v1236_v59 }
 0x6ec   :  { %v1238_v61 = vsub.f32 %v1221_v57, %v1237_v60  ;;  %v1241_v62 = vsub.f32 %v1236_v59, %v1237_v60 }
 0x6ee   :  { %v1239_v63 = vmul.f32 1.442695, %v1238_v61  ;;  %v1242_v0 = vmul.f32 1.442695, %v1241_v62 }
 0x6f0   :  { %v1608_v1 = vpop.eup %1607  ;;  %1611 = vpow2.f32 %v1239_v63 }
 0x6f1   :  { %v1610_v2 = vpop.eup %1609  ;;  %1613 = vpow2.f32 %v1242_v0 }
 0x6f2   :  { %v634_v3 = vadd.f32 %v1610_v2, %v1608_v1 }
 0x6f4   :  { %1615 = vrcp.f32 %v634_v3 }
 0x6fa   :  { %v1612_v4 = vpop.eup %1611 }
 0x6fb   :  { %v1614_v5 = vpop.eup %1613 }
 0x6fc   :  { %v1244_v6 = vadd.f32 %v1614_v5, %v1612_v4 }
 0x6fe   :  { %v1616_v7 = vpop.eup %1615  ;;  %1617 = vrcp.f32 %v1244_v6 }
 0x6ff   :  { %v637_v8 = vmul.f32 %v1616_v7, %v1608_v1  ;;  %v640_v10 = vmul.f32 %v1616_v7, %v1610_v2 }
 0x701   :  { %v638_v12 = vmul.f32 %v637_v8, %v1763_v52  ;;  %v639_v13 = vmul.f32 %v637_v8, %v1761_v50  ;;  %v641_v14 = vmul.f32 %v640_v10, %v1853_v11  ;;  %v642_v15 = vmul.f32 %v640_v10, %v1851_v9 }
 0x703   :  { %v643_v16 = vadd.f32 %v641_v14, %v638_v12  ;;  %v644_v17 = vadd.f32 %v642_v15, %v639_v13 }
 0x705   :  { %645 = vst.msk [vmem:[#allocation2] sm:$0xff] %vm489_vm7, %v643_v16  ;;  %646 = vst.msk [vmem:[#allocation2 + $0x8] sm:$0xff] %vm489_vm7, %v644_v17 }
 0x708   :  { %v1618_v19 = vpop.eup %1617 }
 0x709   :  { %v1247_v21 = vmul.f32 %v1618_v19, %v1612_v4  ;;  %v1250_v22 = vmul.f32 %v1618_v19, %v1614_v5 }
 0x70b   :  { %v1248_v23 = vmul.f32 %v1247_v21, %v1772_v58  ;;  %v1249_v52 = vmul.f32 %v1247_v21, %v1770_v56  ;;  %v1251_v50 = vmul.f32 %v1250_v22, %v1861_v20  ;;  %v1252_v11 = vmul.f32 %v1250_v22, %v1859_v18 }
 0x70d   :  { %v1253_v9 = vadd.f32 %v1251_v50, %v1248_v23  ;;  %v1254_v24 = vadd.f32 %v1252_v11, %v1249_v52 }
 0x70f   :  { %1256 = vst.msk [vmem:[#allocation2 + $0x10] sm:$0xff] %vm489_vm7, %v1253_v9  ;;  %1257 = vst.msk [vmem:[#allocation2 + $0x18] sm:$0xff] %vm489_vm7, %v1254_v24 }
 0x710   :  { %1630 = shalt.err (!%p1627_p4)
}
 0x711   :  { %s1631_s12 = scalar_lea.hbm %s1899_s7, 512 }
 0x712   :  { %p1632_p5 = scmp.ne.s32.totalorder %s1899_s7, %s1631_s12  ;;  %p1635_p6 = scmp.lt.u32.totalorder %s1631_s12, %s1899_s7 }
 0x714   :  { %p1637_p7 = pnand %p1635_p6, %p1632_p5 }
 0x716   :  { %1640 = shalt.err (!%p1637_p7)
}
 0x717   :  { %s1649_s15 = smov 128  }
 0x718   :  { %1269 = dma.vmem_to_hbm [thread:$0]  %s1264_s8, 512, %s1899_s7, [#allocation3], %s1649_s15, %s1649_s15, %s1645_s18  }
 0x719   :  { %1641 = dma.done.wait [#allocation3], 512  }
 0x71a   :  { %1642 = vsyncadd [#allocation3], 4294966784 }
 0x71b   :  { %1273 = vsyncpa [#allocation3], 1 }

</bundles_post_ra>
